<compile_context>
chip_gen: v7x
topology: tpu7x:2x2x1
jax: 0.10.0
libtpu: 0.0.40
codegen_flags: <defaults>
</compile_context>

<pallas_src>
import functools
import math

import jax
import jax.numpy as jnp
from jax import lax
from jax.experimental import pallas as pl
from jax.experimental.pallas import tpu as pltpu


def _round_up(x, m):
    return (x + m - 1) // m * m


# ----------------------------------------------------------------------------
# Prologue: fused QKV projection (runs once over the sequence).
# ----------------------------------------------------------------------------
def _qkv_proj_kernel(x_ref, w_ref, o_ref):
    # x: (proj_block, d_in_pad), w: (d_in_pad, 3*d_pad) -> (proj_block, 3*d_pad)
    o_ref[0] = jnp.dot(x_ref[0], w_ref[...],
                       preferred_element_type=jnp.float32).astype(o_ref.dtype)


# ----------------------------------------------------------------------------
# Flash-attention core over a flattened triangular (qi, ki) grid.
# ----------------------------------------------------------------------------
def _flash_causal_kernel(qi_of_ref, ki_of_ref, q_ref, k_ref, v_ref, o_ref,
                         m_scr, l_scr, acc_scr,
                         *, block_q, block_kv, seq_len):
    step = pl.program_id(1)
    qi = qi_of_ref[step]
    ki = ki_of_ref[step]
    q_start = qi * block_q
    k_start = ki * block_kv

    @pl.when(ki == 0)
    def _init():
        m_scr[...] = jnp.full(m_scr.shape, -1e30, dtype=jnp.float32)
        l_scr[...] = jnp.zeros(l_scr.shape, dtype=jnp.float32)
        acc_scr[...] = jnp.zeros(acc_scr.shape, dtype=jnp.float32)

    q = q_ref[0]                                   # (block_q, d_pad)
    k = k_ref[0]                                   # (block_kv, d_pad)
    v = v_ref[0]                                   # (block_kv, d_pad)

    # s = q @ k^T, contracting the last dims of both operands (no K transpose).
    # 1/sqrt(d_out) is already folded into W_query in the wrapper.
    s = lax.dot_general(q, k, (((1,), (1,)), ((), ())),
                        preferred_element_type=jnp.float32)  # (block_q, block_kv)

    def online_update(s_val):
        m_prev = m_scr[...]
        m_new = jnp.maximum(m_prev, jnp.max(s_val, axis=-1, keepdims=True))
        alpha = jnp.exp(m_prev - m_new)
        p = jnp.exp(s_val - m_new)
        l_scr[...] = alpha * l_scr[...] + jnp.sum(p, axis=-1, keepdims=True)
        acc_scr[...] = alpha * acc_scr[...] + jnp.dot(
            p.astype(v.dtype), v, preferred_element_type=jnp.float32)
        m_scr[...] = m_new

    # Mask is only needed on tiles overlapping the diagonal or containing
    # padded key positions; strictly-past tiles skip the iota/compare/select.
    needs_mask = jnp.logical_or(k_start + (block_kv - 1) > q_start,
                                k_start + (block_kv - 1) >= seq_len)

    @pl.when(needs_mask)
    def _masked():
        q_pos = q_start + lax.broadcasted_iota(jnp.int32, (block_q, block_kv), 0)
        k_pos = k_start + lax.broadcasted_iota(jnp.int32, (block_q, block_kv), 1)
        dead = (k_pos > q_pos) | (k_pos >= seq_len)
        online_update(jnp.where(dead, -1e30, s))

    @pl.when(jnp.logical_not(needs_mask))
    def _unmasked():
        online_update(s)

    # Last KV step for this query tile -> normalize and emit.
    @pl.when((ki + 1) * block_kv >= (qi + 1) * block_q)
    def _finalize():
        # Dropout(p=0.0) is the identity.
        inv_l = pl.reciprocal(l_scr[...], approx=True)
        o_ref[0] = (acc_scr[...] * inv_l).astype(o_ref.dtype)


# ----------------------------------------------------------------------------
# Wrapper
# ----------------------------------------------------------------------------
def _fuse_weights(w_query, w_key, w_value, d_in_pad, d_pad, compute_dtype):
    """[s*Wq | Wk | Wv] transposed to [d_in, 3*d_out] and zero-padded,
    1/sqrt(d_out) folded into W_query."""
    d_out, d_in = w_query.shape
    scale = 1.0 / (float(d_out) ** 0.5)
    w = jnp.zeros((d_in_pad, 3 * d_pad), jnp.float32)
    w = w.at[:d_in, 0 * d_pad:0 * d_pad + d_out].set(w_query.T * scale)
    w = w.at[:d_in, 1 * d_pad:1 * d_pad + d_out].set(w_key.T)
    w = w.at[:d_in, 2 * d_pad:2 * d_pad + d_out].set(w_value.T)
    return w.astype(compute_dtype)


def causal_attention(x, w_query, w_key, w_value, *,
                     block_q=256, block_kv=256, compute_dtype=jnp.bfloat16):
    """x: [B, T, d_in]; w_*: PyTorch-style nn.Linear weights of shape [d_out, d_in].

    block_q/block_kv default to 256 (fills the 256x256 MXU on v6e/v7x);
    use 128 on v5e. compute_dtype is the MXU operand dtype (stats stay f32).
    """
    B, T, d_in = x.shape
    d_out = w_query.shape[0]

    d_in_pad = _round_up(d_in, 128)
    d_pad = _round_up(d_out, 128)
    t_pad = _round_up(T, (block_q * block_kv) // math.gcd(block_q, block_kv))
    n_q = t_pad // block_q
    n_kv = t_pad // block_kv

    # --- inputs padded + cast to compute dtype in the wrapper (smaller DMAs) ---
    x_pad = jnp.zeros((B, t_pad, d_in_pad), compute_dtype)
    x_pad = x_pad.at[:, :T, :d_in].set(x.astype(compute_dtype))
    w_fused = _fuse_weights(w_query, w_key, w_value, d_in_pad, d_pad,
                            compute_dtype)

    # --- prologue: project QKV once (no per-query-tile re-projection) ---
    proj_block = block_kv
    qkv = pl.pallas_call(
        _qkv_proj_kernel,
        out_shape=jax.ShapeDtypeStruct((B, t_pad, 3 * d_pad), compute_dtype),
        grid_spec=pltpu.PrefetchScalarGridSpec(
            num_scalar_prefetch=0,
            grid=(B, t_pad // proj_block),
            in_specs=[
                pl.BlockSpec((1, proj_block, d_in_pad), lambda b, i: (b, i, 0)),
                pl.BlockSpec((d_in_pad, 3 * d_pad), lambda b, i: (0, 0)),
            ],
            out_specs=pl.BlockSpec((1, proj_block, 3 * d_pad),
                                   lambda b, i: (b, i, 0)),
        ),
        compiler_params=pltpu.CompilerParams(
            dimension_semantics=("parallel", "parallel")),
    )(x_pad, w_fused)

    # --- flattened triangular (qi, ki) step tables (scalar-prefetched) ---
    qi_steps, ki_steps = [], []
    for qi in range(n_q):
        last_ki = min(n_kv - 1, ((qi + 1) * block_q - 1) // block_kv)
        for ki in range(last_ki + 1):
            qi_steps.append(qi)
            ki_steps.append(ki)
    num_steps = len(qi_steps)
    qi_of = jnp.asarray(qi_steps, dtype=jnp.int32)
    ki_of = jnp.asarray(ki_steps, dtype=jnp.int32)

    kernel = functools.partial(
        _flash_causal_kernel, block_q=block_q, block_kv=block_kv, seq_len=T)

    out = pl.pallas_call(
        kernel,
        out_shape=jax.ShapeDtypeStruct((B, t_pad, d_pad), x.dtype),
        grid_spec=pltpu.PrefetchScalarGridSpec(
            num_scalar_prefetch=2,
            grid=(B, num_steps),
            in_specs=[
                # q tile (last-dim block 0 of the fused qkv array)
                pl.BlockSpec((1, block_q, d_pad),
                             lambda b, s, qof, kof: (b, qof[s], 0)),
                # k tile (last-dim block 1)
                pl.BlockSpec((1, block_kv, d_pad),
                             lambda b, s, qof, kof: (b, kof[s], 1)),
                # v tile (last-dim block 2)
                pl.BlockSpec((1, block_kv, d_pad),
                             lambda b, s, qof, kof: (b, kof[s], 2)),
            ],
            out_specs=pl.BlockSpec((1, block_q, d_pad),
                                   lambda b, s, qof, kof: (b, qof[s], 0)),
            scratch_shapes=[
                pltpu.VMEM((block_q, 1), jnp.float32),       # running max m
                pltpu.VMEM((block_q, 1), jnp.float32),       # running denom l
                pltpu.VMEM((block_q, d_pad), jnp.float32),   # output accumulator
            ],
        ),
        compiler_params=pltpu.CompilerParams(
            dimension_semantics=("parallel", "arbitrary")),
    )(qi_of, ki_of, qkv, qkv, qkv)

    return out[:, :T, :d_out]


# ----------------------------------------------------------------------------
# Pure-JAX reference mirroring the PyTorch forward.
# ----------------------------------------------------------------------------
def causal_attention_ref(x, w_query, w_key, w_value):
    hp = jax.lax.Precision.HIGHEST
    q = jnp.einsum("btd,od->bto", x, w_query, precision=hp)
    k = jnp.einsum("btd,od->bto", x, w_key, precision=hp)
    v = jnp.einsum("btd,od->bto", x, w_value, precision=hp)
    s = jnp.einsum("btd,bsd->bts", q, k, precision=hp)
    T = x.shape[1]
    mask = jnp.triu(jnp.ones((T, T), dtype=bool), k=1)
    s = jnp.where(mask[None], -jnp.inf, s)
    w = jax.nn.softmax(s / (k.shape[-1] ** 0.5), axis=-1)
    return jnp.einsum("bts,bso->bto", w, v, precision=hp)


if __name__ == "__main__":
    # ---- exact data from the PyTorch script: batch = two copies of `inputs` ----
    inputs = jnp.array(
        [[0.43, 0.15, 0.89],
         [0.55, 0.87, 0.66],
         [0.57, 0.85, 0.64],
         [0.22, 0.58, 0.33],
         [0.77, 0.25, 0.10],
         [0.05, 0.80, 0.55]], dtype=jnp.float32)
    x = jnp.stack((inputs, inputs), axis=0)          # (2, 6, 3)

    d_in = inputs.shape[1]                           # 3
    d_out = 2

    key = jax.random.PRNGKey(0)
    kq, kk, kv = jax.random.split(key, 3)
    bound = 1.0 / (d_in ** 0.5)
    w_query = jax.random.uniform(kq, (d_out, d_in), jnp.float32, -bound, bound)
    w_key   = jax.random.uniform(kk, (d_out, d_in), jnp.float32, -bound, bound)
    w_value = jax.random.uniform(kv, (d_out, d_in), jnp.float32, -bound, bound)

    ref = causal_attention_ref(x, w_query, w_key, w_value)

    # f32 MXU path (tight accuracy check; approx reciprocal ~1e-4 rel error).
    out_f32 = causal_attention(x, w_query, w_key, w_value,
                               compute_dtype=jnp.float32)
    out_f32 = jax.block_until_ready(out_f32)
    assert out_f32.shape == (2, 6, d_out), out_f32.shape
    assert jnp.allclose(out_f32, ref, atol=2e-3, rtol=2e-3), (out_f32, ref)

    # bf16 MXU path with f32 accumulation (performance configuration).
    out_bf16 = causal_attention(x, w_query, w_key, w_value,
                                compute_dtype=jnp.bfloat16)
    out_bf16 = jax.block_until_ready(out_bf16)
    assert out_bf16.shape == (2, 6, d_out), out_bf16.shape
    assert jnp.allclose(out_bf16, ref, atol=3e-2, rtol=3e-2), (out_bf16, ref)

    # ---- multi-tile check: triangular grid, decoupled block_q/block_kv,
    #      masked + mask-free branches, seq padding. ----
    B2, T2, d_in2, d_out2 = 2, 300, 48, 40
    k1, k2, k3, k4 = jax.random.split(jax.random.PRNGKey(1), 4)
    x2 = jax.random.normal(k1, (B2, T2, d_in2), jnp.float32)
    b2 = 1.0 / (d_in2 ** 0.5)
    wq2 = jax.random.uniform(k2, (d_out2, d_in2), jnp.float32, -b2, b2)
    wk2 = jax.random.uniform(k3, (d_out2, d_in2), jnp.float32, -b2, b2)
    wv2 = jax.random.uniform(k4, (d_out2, d_in2), jnp.float32, -b2, b2)
    ref2 = causal_attention_ref(x2, wq2, wk2, wv2)

    out2_f32 = causal_attention(x2, wq2, wk2, wv2, block_q=256, block_kv=128,
                                compute_dtype=jnp.float32)
    out2_f32 = jax.block_until_ready(out2_f32)
    assert out2_f32.shape == (B2, T2, d_out2), out2_f32.shape
    assert jnp.allclose(out2_f32, ref2, atol=1e-2, rtol=1e-2)

    out2_bf16 = causal_attention(x2, wq2, wk2, wv2, block_q=256, block_kv=128,
                                 compute_dtype=jnp.bfloat16)
    out2_bf16 = jax.block_until_ready(out2_bf16)
    assert out2_bf16.shape == (B2, T2, d_out2), out2_bf16.shape
    assert jnp.allclose(out2_bf16, ref2, atol=5e-2, rtol=5e-2)

    print("KERNEL_OK")
</pallas_src>

<mosaic_0001>
module attributes {stable_mosaic.version = 11 : i64} {
  func.func @_qkv_proj_kernel(%arg0: i32, %arg1: i32, %arg2: memref<1x256x128xf32, #tpu.memory_space<vmem>>, %arg3: memref<128x384xf32, #tpu.memory_space<vmem>>, %arg4: memref<1x256x384xf32, #tpu.memory_space<vmem>>) attributes {dimension_semantics = [#tpu.dimension_semantics<parallel>, #tpu.dimension_semantics<parallel>], iteration_bounds = array<i64: 2, 1>, scalar_prefetch = 0 : i64, scratch_operands = 0 : i64, tpu.core_type = #tpu.core_type<tc>, window_params = [{transform_indices = @transform_0, window_bounds = array<i64: 1, 256, 128>}, {pipeline_mode = #tpu.pipeline_mode<synchronous>, transform_indices = @transform_1, window_bounds = array<i64: 128, 384>}, {transform_indices = @transform_2, window_bounds = array<i64: 1, 256, 384>}]} {
    %c0 = arith.constant 0 : index
    %c0_0 = arith.constant 0 : index
    %c0_1 = arith.constant 0 : index
    %0 = vector.load %arg2[%c0, %c0_0, %c0_1] : memref<1x256x128xf32, #tpu.memory_space<vmem>>, vector<1x256x128xf32>
    %1 = vector.shape_cast %0 : vector<1x256x128xf32> to vector<256x128xf32>
    %c0_2 = arith.constant 0 : index
    %c0_3 = arith.constant 0 : index
    %2 = vector.load %arg3[%c0_2, %c0_3] : memref<128x384xf32, #tpu.memory_space<vmem>>, vector<128x384xf32>
    %cst = arith.constant dense<0.000000e+00> : vector<256x384xf32>
    %3 = tpu.matmul %1, %2, %cst {dimension_numbers = #tpu.dot_dimension_numbers<[1], [0], [0], [1], [0, 0, 1, 1], [], []>} : vector<256x128xf32>, vector<128x384xf32>, vector<256x384xf32> -> vector<256x384xf32>
    %c0_4 = arith.constant 0 : index
    %c0_5 = arith.constant 0 : index
    %c0_6 = arith.constant 0 : index
    %4 = vector.load %arg4[%c0_4, %c0_5, %c0_6] : memref<1x256x384xf32, #tpu.memory_space<vmem>>, vector<1x256x384xf32>
    %5 = vector.shape_cast %4 : vector<1x256x384xf32> to vector<256x384xf32>
    %6 = vector.shape_cast %3 : vector<256x384xf32> to vector<1x256x384xf32>
    tpu.vector_store %arg4[%c0_4, %c0_5, %c0_6], %6 {strides = array<i32>} : memref<1x256x384xf32, #tpu.memory_space<vmem>>, vector<1x256x384xf32>,
    return
  }
  func.func @transform_0(%arg0: i32, %arg1: i32) -> (i32, i32, i32) {
    %c0_i32 = arith.constant 0 : i32
    %c0_i32_0 = arith.constant 0 : i32
    return %arg0, %arg1, %c0_i32 : i32, i32, i32
  }
  func.func @transform_1(%arg0: i32, %arg1: i32) -> (i32, i32) {
    %c0_i32 = arith.constant 0 : i32
    %c0_i32_0 = arith.constant 0 : i32
    %c0_i32_1 = arith.constant 0 : i32
    return %c0_i32, %c0_i32_0 : i32, i32
  }
  func.func @transform_2(%arg0: i32, %arg1: i32) -> (i32, i32, i32) {
    %c0_i32 = arith.constant 0 : i32
    %c0_i32_0 = arith.constant 0 : i32
    return %arg0, %arg1, %c0_i32 : i32, i32, i32
  }
}

</mosaic_0001>

<bundles_post_ra>
// kernel: tpu_custom_call.1
= control target key start
LH: loop header
LB: loop body
LE: loop exit
PB: predicated region body
PF: predicated region fallthrough
CT: control target
= control target key end

     0   :  { %7 = vsyncpa [#allocation3], 0  ;;  %s1874_s0 = inlined_call_operand.hbm [shape: f32[2,256,128], index: 0, kind: input, shape index: {}]   ;;  %s1875_s1 = inlined_call_operand.hbm [shape: f32[128,384], index: 1, kind: input, shape index: {}]   ;;  %s1876_s2 = inlined_call_operand.hbm [shape: f32[2,256,384], index: 2, kind: output, shape index: {}]  }
   0x1   :  { %9 = vsyncpa [#allocation3 + $0x1], 0 }
   0x2   :  { %10 = vsyncpa [#allocation6], 0 }
   0x3   :  { %11 = vsyncpa [#allocation4], 0 }
   0x4   :  { %13 = vsyncpa [#allocation4 + $0x1], 0  ;;  %s1445_s9 = smov 0   ;;  %s1447_s10 = smov 0  }
   0x5   :  { %s1449_s11 = smov 0   ;;  %s1451_s12 = smov 0  }
   0x6   :  { %s1453_s13 = smov 0   ;;  %s1455_s14 = smov 0  }
   0x7 LB: > { %s969_s15 = sadd.s32 4294967295, %s1418_s14   ;;  %s970_s16 = sadd.s32 4294967294, %s1418_s14   ;;  %s1418_s14 = sphi %s1455_s14, %s19_s14   ;;  %s1414_s13 = sphi %s1453_s13, %s1900_s13   ;;  %s1410_s12 = sphi %s1451_s12, %s1899_s12   ;;  %s1406_s11 = sphi %s1449_s11, %s1898_s11   ;;  %s1402_s10 = sphi %s1447_s10, %s1897_s10   ;;  %s1398_s9 = sphi %s1445_s9, %s1896_s9  }
   0x8   : > { %p53_p0 = scmp.ne.s32.totalorder %s1402_s10, %s1398_s9  ;;  %p1479_p1 = scmp.eq.s32.totalorder %s969_s15, 0 }
   0x9   : > { %p1483_p2 = scmp.eq.s32.totalorder %s969_s15, 1  ;;  %p106_p3 = scmp.eq.s32.totalorder %s970_s16, 1 }
   0xa   : > { %s1881_s17 = scalar_select %p1479_p1, 1, 0 }
   0xb   : > { %s1882_s18 = scalar_select %p1483_p2, 1, 0 }
   0xc   : > { %p1489_p4 = por %p1479_p1, %p53_p0  ;;  %p971_p5 = scmp.ge.s32.totalorder %s1418_s14, 1 }
   0xd   : > { %p1494_p6 = por %p106_p3, %p53_p0  ;;  %p113_p7 = scmp.lt.s32.totalorder %s1418_s14, 3 }
   0xe   : > { %s1883_s19 = scalar_select %p1489_p4, 1, 0 }
   0xf   : > { %s1884_s20 = scalar_select %p1494_p6, 1, 0 }
  0x10   : > { %p1499_p8 = pnand %p971_p5, %p113_p7  ;;  %s1420_s22 = smov [#allocation5]  }
  0x11   : > { %s125_s23 = sshll.u32 %s1420_s22, 4  ;;  %s31_s25 = sadd.s32 1, %s1414_s13  ;;  %s126_s23 = int_to_ptr.vmem [resolvable:$true] %s125_s23 }
  0x12   : > { %s1885_s21 = scalar_select %p1499_p8, 1, 0 }
  0x13   : > { %p1202_p9 = pneg %p1499_p8  ;;  %s1274_s28 = scalar_lea.hbm %s1875_s1, 6144 }
  0x14   : > { %p1275_p12 = scmp.ne.s32.totalorder %s1875_s1, %s1274_s28  ;;  %p1281_p5 = scmp.lt.u32.totalorder %s1274_s28, %s1875_s1 }
  0x15   : > { %p1508_p11 = pnand %p1202_p9, %p1479_p1 }
  0x17   : > { %p1276_p13 = pneg %p1508_p11 }
  0x19   : > { %p1277_p0 = pnand %p1276_p13, %p1275_p12 }
  0x1b   : > { %p1278_p3 = pneg %p1277_p0 }
  0x1d   : > { %p1283_p7 = pnand %p1281_p5, %p1278_p3 }
  0x1f   : > { %1286 = shalt.err (!%p1283_p7)
}
  0x20   : > { %s1287_s5 = scalar_lea.vmem %s126_s23, 6144  ;;  %p1295_p1 = scmp.lt.s32.totalorder %s126_s23, %s126_s23 }
  0x21   : > { %p1288_p9 = scmp.ne.s32.totalorder %s126_s23, %s1287_s5  ;;  %p1296_p4 = scmp.lt.s32.totalorder %s1287_s5, %s1287_s5 }
  0x23   : > { %p1290_p10 = pnand %p1288_p9, %p1276_p13  ;;  %p1297_p8 = por %p1296_p4, %p1295_p1 }
  0x25   : > { %p1291_p6 = pneg %p1290_p10 }
  0x27   : > { %p1298_p2 = pnand %p1297_p8, %p1291_p6 }
  0x29   : > { %1301 = shalt.err (!%p1298_p2)
}
  0x2a   : > { %s1421_s6 = smov 384   ;;  %s1422_s7 = smov 24  }
  0x2b   : > { %1205 = dma.hbm_to_vmem [thread:$0]  (!%p1508_p11), %s1875_s1, 6144, %s126_s23, [#allocation6], %s1421_s6, %s1421_s6, %s1422_s7  }
  0x2c   : > { %p33_p1 = scmp.ge.s32.totalorder %s31_s25, 2  ;;  %s40_s16 = sadd.s32 1, %s1406_s11 }
  0x2d   : > { %p47_p2 = scmp.ne.s32.totalorder %s1406_s11, %s1402_s10  ;;  %p48_p4 = scmp.eq.s32.totalorder %s1418_s14, 0 }
  0x2e   : > { %s1902_s25 = smov (%p33_p1, %s31_s25), 0  ;;  %p1888_p8 = scmp.ne.s32.totalorder %s1882_s18, 0 }
  0x2f   : > { %p1535_p6 = por %p48_p4, %p47_p2  ;;  %s35_s24 = ssub.s32 %s1414_s13, %s1902_s25 }
  0x30   : > { %p1541_p10 = por %p1888_p8, %p47_p2  ;;  %p1215_p12 = scmp.lt.s32.totalorder %s1418_s14, 2 }
  0x31   : > { %p38_p11 = scmp.eq.s32.totalorder %s35_s24, 0  ;;  %s139_s23 = sand.u32 1, %s1406_s11  }
  0x32   : > { %s974_s27 = sshll.u32 %s139_s23, 8  ;;  %s983_s29 = sshll.u32 %s1414_s13, 12 }
  0x33   : > { %s1550_s28 = scalar_select %p38_p11, %s1406_s11, %s40_s16  }
  0x34   : > { %s1556_s4 = scalar_lea.hbm %s1874_s0, %s983_s29  ;;  %s143_s18 = scalar_lea.vmem [#allocation2], %s974_s27 }
  0x35   : > { %s152_s5 = sshll.u32 %s143_s18, 4  ;;  %p1562_p13 = pnand %p1215_p12, %p1535_p6  ;;  %s1558_s5 = int_to_ptr.vmem [resolvable:$true] %s152_s5 }
  0x36   : > { %s1566_s7 = scalar_lea.sflag [#allocation3], %s139_s23  ;;  %s1302_s8 = scalar_lea.hbm %s1556_s4, 4096 }
  0x37   : > { %p1303_p0 = scmp.ne.s32.totalorder %s1556_s4, %s1302_s8  ;;  %p1304_p3 = pneg %p1562_p13 }
  0x38   : > { %s1307_s22 = scalar_lea.hbm %s1874_s0, 8192  ;;  %p1308_p9 = scmp.lt.u32.totalorder %s1556_s4, %s1874_s0 }
  0x39   : > { %p1305_p5 = pnand %p1304_p3, %p1303_p0  ;;  %p1309_p1 = scmp.lt.u32.totalorder %s1307_s22, %s1302_s8 }
  0x3a   : > { %p1311_p4 = scmp.lt.u32.totalorder %s1302_s8, %s1556_s4 }
  0x3b   : > { %p1306_p7 = pneg %p1305_p5  ;;  %p1310_p2 = por %p1309_p1, %p1308_p9 }
  0x3d   : > { %p1312_p6 = por %p1311_p4, %p1310_p2 }
  0x3f   : > { %p1313_p8 = pnand %p1312_p6, %p1306_p7 }
  0x41   : > { %1316 = shalt.err (!%p1313_p8)
}
  0x42   : > { %s1317_s23 = scalar_lea.vmem %s1558_s5, 4096  ;;  %s1423_s29 = smov [#allocation2]  }
  0x43   : > { %p1318_p12 = scmp.ne.s32.totalorder %s1558_s5, %s1317_s23  ;;  %s1322_s30 = sshll.u32 %s1423_s29, 4  ;;  %s1323_s30 = int_to_ptr.vmem [resolvable:$false] %s1322_s30 }
  0x44   : > { %s1324_s3 = scalar_lea.vmem %s1323_s30, 8192  ;;  %p1325_p5 = scmp.lt.s32.totalorder %s1558_s5, %s1323_s30 }
  0x45   : > { %p1320_p11 = pnand %p1318_p12, %p1304_p3  ;;  %p1326_p9 = scmp.lt.s32.totalorder %s1324_s3, %s1317_s23 }
  0x47   : > { %p1321_p0 = pneg %p1320_p11  ;;  %p1327_p1 = por %p1326_p9, %p1325_p5 }
  0x49   : > { %p1328_p2 = pnand %p1327_p1, %p1321_p0 }
  0x4b   : > { %1331 = shalt.err (!%p1328_p2)
}
  0x4c   : > { %s1424_s18 = smov 128   ;;  %s1425_s8 = smov 8  }
  0x4d   : > { %1209 = dma.hbm_to_vmem [thread:$0]  (!%p1562_p13), %s1556_s4, 4096, %s1558_s5, %s1566_s7, %s1424_s18, %s1424_s18, %s1425_s8  }
  0x4e   : > { %p1891_p3 = scmp.ne.s32.totalorder %s1885_s21, 0 }
  0x4f   : > { %s1597_s15 = sand.u32 (!%p1891_p3), 1, %s1402_s10   ;;  %p1892_p7 = scmp.ne.s32.totalorder (!%p1891_p3), %s1883_s19, 0 }
  0x50   : > { %164 = sbr.rel (%p1891_p3) target bundleno = 446 (0x1be), region = 28  ;;  %s978_s16 = sshll.u32 (!%p1891_p3), %s1597_s15, 8 }
  0x51   : > { %s167_s22 = scalar_lea.sflag (!%p1891_p3), [#allocation3], %s1597_s15  ;;  %s1601_s24 = scalar_lea.vmem (!%p1891_p3), [#allocation2], %s978_s16 }
  0x57   : > { %1385 = dma.done.wait (%p1892_p7), %s167_s22, 4096  }
  0x58   : > { %1387 = vsyncadd (%p1892_p7), %s167_s22, 4294963200  ;;  %p1893_p13 = scmp.ne.s32.totalorder %s1881_s17, 0 }
  0x5a   : > { %1389 = dma.done.wait (%p1893_p13), [#allocation6], 6144  }
  0x5b   : > { %1391 = vsyncadd (%p1893_p13), [#allocation6], 4294961152  ;;  %v1426_v0 = vmov 0.0   ;;  %v230_v1 = vld [vmem:[#allocation5 + $0x8] sm:$0xff]  ;;  %v233_v2 = vld [vmem:[#allocation5 + $0x20] sm:$0xff]  ;;  %s1192_s17 = smul.u32 768, %s1597_s15 }
  0x5c   : > { %341 = vmatprep.mubr.f32.mxu0 %v1426_v0  ;;  %485 = vmatprep.mubr.f32.mxu1 %v1426_v0  ;;  %v229_v3 = vld [vmem:[#allocation5] sm:$0xff]  ;;  %v1112_v4 = vpack.c.bf16 %v233_v2, %v230_v1  ;;  %v232_v5 = vld [vmem:[#allocation5 + $0x18] sm:$0xff]  ;;  %v239_v7 = vld [vmem:[#allocation5 + $0x50] sm:$0xff]  ;;  %s1193_s21 = smul.u32 12288, %s1410_s12  ;;  %s856_s12 = scalar_lea.sflag [#allocation4], %s1597_s15 }
  0x5d   : > { %v236_v6 = vld [vmem:[#allocation5 + $0x38] sm:$0xff]  ;;  %v1114_v8 = vpack.c.bf16 %v232_v5, %v229_v3  ;;  %v235_v10 = vld [vmem:[#allocation5 + $0x30] sm:$0xff]  ;;  %v238_v11 = vld [vmem:[#allocation5 + $0x48] sm:$0xff]  ;;  %s1720_s19 = scalar_lea.vmem [#allocation7], %s1192_s17  ;;  %s1427_s23 = smov [#allocation7]  }
  0x5e   : > { %v1116_v9 = vpack.c.bf16 %v239_v7, %v236_v6  ;;  %v242_v12 = vld [vmem:[#allocation5 + $0x68] sm:$0xff]  ;;  %1113 = vmatprep.subr.bf16.mxu0 %v1112_v4  ;;  %1176 = vmatprep.subr.bf16.mxu1 %v1112_v4  ;;  %v245_v13 = vld [vmem:[#allocation5 + $0x80] sm:$0xff]  ;;  %v1118_v14 = vpack.c.bf16 %v238_v11, %v235_v10  ;;  %v244_v17 = vld [vmem:[#allocation5 + $0x78] sm:$0xff]  ;;  %s872_s4 = sshll.u32 %s1720_s19, 4  ;;  %s1819_s7 = scalar_lea.hbm %s1876_s2, %s1193_s21  ;;  %s1821_s4 = int_to_ptr.vmem [resolvable:$true] %s872_s4 }
  0x5f   : > { %1115 = vmatpush1.bf16.msra.mxu0 %v1114_v8  ;;  %1184 = vmatpush1.bf16.msra.mxu1 %v1114_v8  ;;  %v1120_v15 = vpack.c.bf16 %v245_v13, %v242_v12  ;;  %v241_v16 = vld [vmem:[#allocation5 + $0x60] sm:$0xff]  ;;  %v248_v18 = vld [vmem:[#allocation5 + $0x98] sm:$0xff]  ;;  %v251_v19 = vld [vmem:[#allocation5 + $0xb0] sm:$0xff]  ;;  %s1332_s27 = scalar_lea.vmem %s1821_s4, 12288  ;;  %s1336_s29 = sshll.u32 %s1427_s23, 4  ;;  %s1337_s29 = int_to_ptr.vmem [resolvable:$false] %s1336_s29 }
  0x60   : > { %1117 = vmatprep.subr.bf16.mxu0 %v1116_v9  ;;  %1177 = vmatprep.subr.bf16.mxu1 %v1116_v9  ;;  %v1122_v20 = vpack.c.bf16 %v244_v17, %v241_v16  ;;  %v1124_v21 = vpack.c.bf16 %v251_v19, %v248_v18  ;;  %v247_v22 = vld [vmem:[#allocation5 + $0x90] sm:$0xff]  ;;  %v250_v23 = vld [vmem:[#allocation5 + $0xa8] sm:$0xff]  ;;  %v257_v25 = vld [vmem:[#allocation5 + $0xe0] sm:$0xff]  ;;  %p1333_p4 = scmp.ne.s32.totalorder %s1821_s4, %s1332_s27  ;;  %s1338_s30 = scalar_lea.vmem %s1337_s29, 24576 }
  0x61   : > { %v254_v24 = vld [vmem:[#allocation5 + $0xc8] sm:$0xff]  ;;  %v1126_v26 = vpack.c.bf16 %v250_v23, %v247_v22  ;;  %v253_v28 = vld [vmem:[#allocation5 + $0xc0] sm:$0xff]  ;;  %v256_v29 = vld [vmem:[#allocation5 + $0xd8] sm:$0xff]  ;;  %p1339_p12 = scmp.lt.s32.totalorder %s1821_s4, %s1337_s29  ;;  %p1340_p11 = scmp.lt.s32.totalorder %s1338_s30, %s1332_s27 }
  0x62   : > { %v1128_v27 = vpack.c.bf16 %v257_v25, %v254_v24  ;;  %v260_v30 = vld [vmem:[#allocation5 + $0xf8] sm:$0xff]  ;;  %v263_v31 = vld [vmem:[#allocation5 + $0x110] sm:$0xff]  ;;  %v1130_v32 = vpack.c.bf16 %v256_v29, %v253_v28  ;;  %v262_v35 = vld [vmem:[#allocation5 + $0x108] sm:$0xff]  ;;  %p1334_p6 = pnand %p1333_p4, %p1541_p10 }
  0x63   : > { %1119 = vmatpush1.bf16.msra.mxu0 %v1118_v14  ;;  %1185 = vmatpush1.bf16.msra.mxu1 %v1118_v14  ;;  %v1132_v33 = vpack.c.bf16 %v263_v31, %v260_v30  ;;  %v259_v34 = vld [vmem:[#allocation5 + $0xf0] sm:$0xff]  ;;  %v266_v36 = vld [vmem:[#allocation5 + $0x128] sm:$0xff]  ;;  %v269_v37 = vld [vmem:[#allocation5 + $0x140] sm:$0xff]  ;;  %p1341_p0 = por %p1340_p11, %p1339_p12 }
  0x64   : > { %1121 = vmatprep.subr.bf16.mxu0 %v1120_v15  ;;  %1178 = vmatprep.subr.bf16.mxu1 %v1120_v15  ;;  %v1134_v38 = vpack.c.bf16 %v262_v35, %v259_v34  ;;  %v1136_v39 = vpack.c.bf16 %v269_v37, %v266_v36  ;;  %v265_v40 = vld [vmem:[#allocation5 + $0x120] sm:$0xff]  ;;  %v268_v41 = vld [vmem:[#allocation5 + $0x138] sm:$0xff]  ;;  %v275_v43 = vld [vmem:[#allocation5 + $0x170] sm:$0xff]  ;;  %p1335_p8 = pneg %p1334_p6 }
  0x65   : > { %v272_v42 = vld [vmem:[#allocation5 + $0x158] sm:$0xff]  ;;  %v1138_v44 = vpack.c.bf16 %v268_v41, %v265_v40  ;;  %v271_v46 = vld [vmem:[#allocation5 + $0x150] sm:$0xff]  ;;  %v274_v47 = vld [vmem:[#allocation5 + $0x168] sm:$0xff] }
  0x66   : > { %v1140_v45 = vpack.c.bf16 %v275_v43, %v272_v42  ;;  %v231_v48 = vld [vmem:[#allocation5 + $0x10] sm:$0xff]  ;;  %v234_v49 = vld [vmem:[#allocation5 + $0x28] sm:$0xff]  ;;  %v1142_v50 = vpack.c.bf16 %v274_v47, %v271_v46  ;;  %v237_v52 = vld [vmem:[#allocation5 + $0x40] sm:$0xff]  ;;  %p1342_p5 = pnand %p1341_p0, %p1335_p8 }
  0x67   : > { %1123 = vmatpush1.bf16.msra.mxu0 %v1122_v20  ;;  %1186 = vmatpush1.bf16.msra.mxu1 %v1122_v20  ;;  %v1144_v51 = vpack.c.bf16 %v234_v49, %v231_v48  ;;  %v240_v53 = vld [vmem:[#allocation5 + $0x58] sm:$0xff]  ;;  %v1614_v54 = vld [vmem:[%s1601_s24] sm:$0xff]  ;;  %v243_v57 = vld [vmem:[#allocation5 + $0x70] sm:$0xff] }
  0x68   : > { %1125 = vmatprep.subr.bf16.mxu0 %v1124_v21  ;;  %1179 = vmatprep.subr.bf16.mxu1 %v1124_v21  ;;  %v1617_v55 = vld [vmem:[%s1601_s24 + $0xc0] sm:$0xff]  ;;  %v1148_v56 = vpack.c.bf16 %v240_v53, %v237_v52  ;;  %v246_v58 = vld [vmem:[#allocation5 + $0x88] sm:$0xff]  ;;  %v252_v63 = vld [vmem:[#allocation5 + $0xb8] sm:$0xff] }
  0x69   : > { %v1623_v59 = vld [vmem:[%s1601_s24 + $0x8] sm:$0xff]  ;;  %v1152_v61 = vpack.c.bf16 %v246_v58, %v243_v57  ;;  %v249_v62 = vld [vmem:[#allocation5 + $0xa0] sm:$0xff]  ;;  %v1633_v1 = vld [vmem:[%s1601_s24 + $0x10] sm:$0xff] }
  0x6a   : > { %v1626_v60 = vld [vmem:[%s1601_s24 + $0xc8] sm:$0xff]  ;;  %v1636_v2 = vld [vmem:[%s1601_s24 + $0xd0] sm:$0xff]  ;;  %v1156_v3 = vpack.c.bf16 %v252_v63, %v249_v62  ;;  %v200_v6 = vld [vmem:[%s1601_s24 + $0x18] sm:$0xff] }
  0x6b   : > { %1127 = vmatpush1.bf16.msra.mxu0 %v1126_v26  ;;  %1187 = vmatpush1.bf16.msra.mxu1 %v1126_v26  ;;  %v255_v4 = vld [vmem:[#allocation5 + $0xd0] sm:$0xff]  ;;  %v258_v5 = vld [vmem:[#allocation5 + $0xe8] sm:$0xff]  ;;  %v1644_v7 = vld [vmem:[%s1601_s24 + $0xd8] sm:$0xff] }
  0x6c   : > { %1129 = vmatprep.subr.bf16.mxu0 %v1128_v27  ;;  %1180 = vmatprep.subr.bf16.mxu1 %v1128_v27  ;;  %v1160_v8 = vpack.c.bf16 %v258_v5, %v255_v4  ;;  %v261_v9 = vld [vmem:[#allocation5 + $0x100] sm:$0xff]  ;;  %v264_v10 = vld [vmem:[#allocation5 + $0x118] sm:$0xff]  ;;  %v267_v14 = vld [vmem:[#allocation5 + $0x130] sm:$0xff] }
  0x6d   : > { %v201_v11 = vld [vmem:[%s1601_s24 + $0x20] sm:$0xff]  ;;  %v1164_v13 = vpack.c.bf16 %v264_v10, %v261_v9  ;;  %v270_v15 = vld [vmem:[#allocation5 + $0x148] sm:$0xff]  ;;  %v276_v20 = vld [vmem:[#allocation5 + $0x178] sm:$0xff] }
  0x6e   : > { %v1651_v12 = vld [vmem:[%s1601_s24 + $0xe0] sm:$0xff]  ;;  %v202_v16 = vld [vmem:[%s1601_s24 + $0x28] sm:$0xff]  ;;  %v1168_v18 = vpack.c.bf16 %v270_v15, %v267_v14  ;;  %v203_v21 = vld [vmem:[%s1601_s24 + $0x30] sm:$0xff] }
  0x6f   : > { %1131 = vmatpush1.bf16.msra.mxu0 %v1130_v32  ;;  %1188 = vmatpush1.bf16.msra.mxu1 %v1130_v32  ;;  %v1658_v17 = vld [vmem:[%s1601_s24 + $0xe8] sm:$0xff]  ;;  %v273_v19 = vld [vmem:[#allocation5 + $0x160] sm:$0xff]  ;;  %v1665_v22 = vld [vmem:[%s1601_s24 + $0xf0] sm:$0xff] }
  0x70   : > { %1133 = vmatprep.subr.bf16.mxu0 %v1132_v33  ;;  %1181 = vmatprep.subr.bf16.mxu1 %v1132_v33  ;;  %v1172_v23 = vpack.c.bf16 %v276_v20, %v273_v19  ;;  %v204_v24 = vld [vmem:[%s1601_s24 + $0x38] sm:$0xff]  ;;  %v205_v26 = vld [vmem:[%s1601_s24 + $0x40] sm:$0xff]  ;;  %v206_v27 = vld [vmem:[%s1601_s24 + $0x48] sm:$0xff] }
  0x71   : > { %v1672_v25 = vld [vmem:[%s1601_s24 + $0xf8] sm:$0xff]  ;;  %v207_v28 = vld [vmem:[%s1601_s24 + $0x50] sm:$0xff]  ;;  %v209_v30 = vld [vmem:[%s1601_s24 + $0x60] sm:$0xff] }
  0x72   : > { %v208_v29 = vld [vmem:[%s1601_s24 + $0x58] sm:$0xff]  ;;  %v210_v31 = vld [vmem:[%s1601_s24 + $0x68] sm:$0xff]  ;;  %v211_v32 = vld [vmem:[%s1601_s24 + $0x70] sm:$0xff] }
  0x73   : > { %1135 = vmatpush1.bf16.msra.mxu0 %v1134_v38  ;;  %1189 = vmatpush1.bf16.msra.mxu1 %v1134_v38  ;;  %v212_v33 = vld [vmem:[%s1601_s24 + $0x78] sm:$0xff]  ;;  %v213_v34 = vld [vmem:[%s1601_s24 + $0x80] sm:$0xff]  ;;  %v214_v35 = vld [vmem:[%s1601_s24 + $0x88] sm:$0xff] }
  0x74   : > { %1137 = vmatprep.subr.bf16.mxu0 %v1136_v39  ;;  %1182 = vmatprep.subr.bf16.mxu1 %v1136_v39  ;;  %v215_v36 = vld [vmem:[%s1601_s24 + $0x90] sm:$0xff]  ;;  %v216_v37 = vld [vmem:[%s1601_s24 + $0x98] sm:$0xff]  ;;  %v217_v38 = vld [vmem:[%s1601_s24 + $0xa0] sm:$0xff] }
  0x75   : > { %v218_v39 = vld [vmem:[%s1601_s24 + $0xa8] sm:$0xff]  ;;  %v219_v40 = vld [vmem:[%s1601_s24 + $0xb0] sm:$0xff]  ;;  %v220_v41 = vld [vmem:[%s1601_s24 + $0xb8] sm:$0xff] }
  0x77   : > { %1139 = vmatpush1.bf16.msra.mxu0 %v1138_v44  ;;  %1190 = vmatpush1.bf16.msra.mxu1 %v1138_v44 }
  0x78   : > { %1141 = vmatprep.subr.bf16.mxu0 %v1140_v45  ;;  %1183 = vmatprep.subr.bf16.mxu1 %v1140_v45 }
  0x7b   : > { %1143 = vmatpush1.bf16.msra.mxu0 %v1142_v50  ;;  %1191 = vmatpush1.bf16.msra.mxu1 %v1142_v50 }
  0x7c   : > { %1145 = vmatprep.subr.bf16.mxu1 %v1144_v51 }
  0x7e   : > { %342 = vmatmul.mubr.f32.vlgmr.msra.gmra.mrb[0].mxu0 %v1614_v54  ;;  %486 = vmatmul.mubr.f32.vlgmr.msra.gmra.mrb[0].mxu1 %v1617_v55 }
  0x7f   : > { %1147 = vmatpush3.bf16.msra.mxu1 %v1144_v51  ;;  %347 = vmatprep.mubr.f32.mxu0 %v1426_v0 }
  0x80   : > { %491 = vmatprep.mubr.f32.mxu1 %v1426_v0  ;;  %1149 = vmatprep.subr.bf16.mxu1 %v1148_v56 }
  0x82   : > { %348 = vmatmul.mubr.f32.gmra.mrb[2].mxu0 %v1623_v59  ;;  %492 = vmatmul.mubr.f32.gmra.mrb[2].mxu1 %v1626_v60 }
  0x83   : > { %1151 = vmatpush3.bf16.msra.mxu1 %v1148_v56  ;;  %353 = vmatprep.mubr.f32.mxu0 %v1426_v0 }
  0x84   : > { %497 = vmatprep.mubr.f32.mxu1 %v1426_v0  ;;  %1153 = vmatprep.subr.bf16.mxu1 %v1152_v61 }
  0x86   : > { %354 = vmatmul.mubr.f32.gmra.mrb[4].mxu0 %v1633_v1  ;;  %498 = vmatmul.mubr.f32.gmra.mrb[4].mxu1 %v1636_v2 }
  0x87   : > { %1155 = vmatpush3.bf16.msra.mxu1 %v1152_v61  ;;  %359 = vmatprep.mubr.f32.mxu0 %v1426_v0 }
  0x88   : > { %503 = vmatprep.mubr.f32.mxu1 %v1426_v0  ;;  %1157 = vmatprep.subr.bf16.mxu1 %v1156_v3 }
  0x8a   : > { %360 = vmatmul.mubr.f32.gmra.mrb[6].mxu0 %v200_v6  ;;  %504 = vmatmul.mubr.f32.gmra.mrb[6].mxu1 %v1644_v7 }
  0x8b   : > { %1159 = vmatpush3.bf16.msra.mxu1 %v1156_v3  ;;  %365 = vmatprep.mubr.f32.mxu0 %v1426_v0 }
  0x8c   : > { %509 = vmatprep.mubr.f32.mxu1 %v1426_v0  ;;  %1161 = vmatprep.subr.bf16.mxu1 %v1160_v8 }
  0x8e   : > { %366 = vmatmul.mubr.f32.gmra.mrb[8].mxu0 %v201_v11  ;;  %510 = vmatmul.mubr.f32.gmra.mrb[8].mxu1 %v1651_v12 }
  0x8f   : > { %1163 = vmatpush3.bf16.msra.mxu1 %v1160_v8  ;;  %371 = vmatprep.mubr.f32.mxu0 %v1426_v0 }
  0x90   : > { %515 = vmatprep.mubr.f32.mxu1 %v1426_v0  ;;  %1165 = vmatprep.subr.bf16.mxu1 %v1164_v13 }
  0x92   : > { %372 = vmatmul.mubr.f32.gmra.mrb[10].mxu0 %v202_v16  ;;  %516 = vmatmul.mubr.f32.gmra.mrb[10].mxu1 %v1658_v17 }
  0x93   : > { %1167 = vmatpush3.bf16.msra.mxu1 %v1164_v13  ;;  %377 = vmatprep.mubr.f32.mxu0 %v1426_v0 }
  0x94   : > { %521 = vmatprep.mubr.f32.mxu1 %v1426_v0  ;;  %1169 = vmatprep.subr.bf16.mxu1 %v1168_v18 }
  0x96   : > { %378 = vmatmul.mubr.f32.gmra.mrb[12].mxu0 %v203_v21  ;;  %522 = vmatmul.mubr.f32.gmra.mrb[12].mxu1 %v1665_v22 }
  0x97   : > { %1171 = vmatpush3.bf16.msra.mxu1 %v1168_v18  ;;  %383 = vmatprep.mubr.f32.mxu0 %v1426_v0 }
  0x98   : > { %527 = vmatprep.mubr.f32.mxu1 %v1426_v0  ;;  %1173 = vmatprep.subr.bf16.mxu1 %v1172_v23 }
  0x9a   : > { %384 = vmatmul.mubr.f32.gmra.mrb[14].mxu0 %v204_v24  ;;  %528 = vmatmul.mubr.f32.gmra.mrb[14].mxu1 %v1672_v25 }
  0x9b   : > { %1175 = vmatpush3.bf16.msra.mxu1 %v1172_v23  ;;  %389 = vmatprep.mubr.f32.mxu0 %v1426_v0 }
  0x9c   : > { %1064 = vmatprep.mubr.f32.mxu1 %v1614_v54 }
  0x9e   : > { %390 = vmatmul.mubr.f32.gmra.mrb[16].mxu0 %v205_v26  ;;  %1065 = vmatmul.mubr.f32.vlgmr.msra.gmra.mrb[16].mxu1 %v1623_v59 }
  0x9f   : > { %395 = vmatprep.mubr.f32.mxu0 %v1426_v0  ;;  %1067 = vmatprep.mubr.f32.mxu1 %v1633_v1 }
  0xa2   : > { %396 = vmatmul.mubr.f32.gmra.mrb[18].mxu0 %v206_v27  ;;  %1068 = vmatmul.mubr.f32.gmra.mrb[18].mxu1 %v200_v6 }
  0xa3   : > { %401 = vmatprep.mubr.f32.mxu0 %v1426_v0  ;;  %1070 = vmatprep.mubr.f32.mxu1 %v201_v11 }
  0xa6   : > { %402 = vmatmul.mubr.f32.gmra.mrb[20].mxu0 %v207_v28  ;;  %1071 = vmatmul.mubr.f32.gmra.mrb[20].mxu1 %v202_v16 }
  0xa7   : > { %407 = vmatprep.mubr.f32.mxu0 %v1426_v0  ;;  %1073 = vmatprep.mubr.f32.mxu1 %v203_v21 }
  0xaa   : > { %408 = vmatmul.mubr.f32.gmra.mrb[22].mxu0 %v208_v29  ;;  %1074 = vmatmul.mubr.f32.gmra.mrb[22].mxu1 %v204_v24 }
  0xab   : > { %413 = vmatprep.mubr.f32.mxu0 %v1426_v0  ;;  %1076 = vmatprep.mubr.f32.mxu1 %v205_v26 }
  0xae   : > { %414 = vmatmul.mubr.f32.gmra.mrb[24].mxu0 %v209_v30  ;;  %1077 = vmatmul.mubr.f32.gmra.mrb[24].mxu1 %v206_v27 }
  0xaf   : > { %419 = vmatprep.mubr.f32.mxu0 %v1426_v0  ;;  %1079 = vmatprep.mubr.f32.mxu1 %v207_v28 }
  0xb2   : > { %420 = vmatmul.mubr.f32.gmra.mrb[26].mxu0 %v210_v31  ;;  %1080 = vmatmul.mubr.f32.gmra.mrb[26].mxu1 %v208_v29 }
  0xb3   : > { %425 = vmatprep.mubr.f32.mxu0 %v1426_v0  ;;  %1082 = vmatprep.mubr.f32.mxu1 %v209_v30 }
  0xb6   : > { %426 = vmatmul.mubr.f32.gmra.mrb[28].mxu0 %v211_v32  ;;  %1083 = vmatmul.mubr.f32.gmra.mrb[28].mxu1 %v210_v31 }
  0xb7   : > { %431 = vmatprep.mubr.f32.mxu0 %v1426_v0  ;;  %1085 = vmatprep.mubr.f32.mxu1 %v211_v32 }
  0xba   : > { %432 = vmatmul.mubr.f32.gmra.mrb[30].mxu0 %v212_v33  ;;  %1086 = vmatmul.mubr.f32.gmra.mrb[30].mxu1 %v212_v33 }
  0xbb   : > { %437 = vmatprep.mubr.f32.mxu0 %v1426_v0  ;;  %1088 = vmatprep.mubr.f32.mxu1 %v213_v34 }
  0xbe   : > { %438 = vmatmul.mubr.f32.gmra.mrb[32].mxu0 %v213_v34  ;;  %1089 = vmatmul.mubr.f32.gmra.mrb[32].mxu1 %v214_v35 }
  0xbf   : > { %443 = vmatprep.mubr.f32.mxu0 %v1426_v0  ;;  %1091 = vmatprep.mubr.f32.mxu1 %v215_v36 }
  0xc2   : > { %444 = vmatmul.mubr.f32.gmra.mrb[34].mxu0 %v214_v35  ;;  %1092 = vmatmul.mubr.f32.gmra.mrb[34].mxu1 %v216_v37 }
  0xc3   : > { %449 = vmatprep.mubr.f32.mxu0 %v1426_v0  ;;  %1094 = vmatprep.mubr.f32.mxu1 %v217_v38 }
  0xc6   : > { %450 = vmatmul.mubr.f32.gmra.mrb[36].mxu0 %v215_v36  ;;  %1095 = vmatmul.mubr.f32.gmra.mrb[36].mxu1 %v218_v39 }
  0xc7   : > { %455 = vmatprep.mubr.f32.mxu0 %v1426_v0  ;;  %1097 = vmatprep.mubr.f32.mxu1 %v219_v40 }
  0xca   : > { %456 = vmatmul.mubr.f32.gmra.mrb[38].mxu0 %v216_v37  ;;  %1098 = vmatmul.mubr.f32.gmra.mrb[38].mxu1 %v220_v41 }
  0xcb   : > { %461 = vmatprep.mubr.f32.mxu0 %v1426_v0  ;;  %1100 = vmatprep.mubr.f32.mxu1 %v1617_v55 }
  0xce   : > { %462 = vmatmul.mubr.f32.gmra.mrb[40].mxu0 %v217_v38  ;;  %1101 = vmatmul.mubr.f32.gmra.mrb[40].mxu1 %v1626_v60 }
  0xcf   : > { %467 = vmatprep.mubr.f32.mxu0 %v1426_v0  ;;  %1103 = vmatprep.mubr.f32.mxu1 %v1636_v2 }
  0xd2   : > { %468 = vmatmul.mubr.f32.gmra.mrb[42].mxu0 %v218_v39  ;;  %1104 = vmatmul.mubr.f32.gmra.mrb[42].mxu1 %v1644_v7 }
  0xd3   : > { %473 = vmatprep.mubr.f32.mxu0 %v1426_v0  ;;  %1106 = vmatprep.mubr.f32.mxu1 %v1651_v12 }
  0xd6   : > { %474 = vmatmul.mubr.f32.gmra.mrb[44].mxu0 %v219_v40  ;;  %1107 = vmatmul.mubr.f32.gmra.mrb[44].mxu1 %v1658_v17 }
  0xd7   : > { %479 = vmatprep.mubr.f32.mxu0 %v1426_v0  ;;  %1109 = vmatprep.mubr.f32.mxu1 %v1665_v22 }
  0xda   : > { %480 = vmatmul.mubr.f32.gmra.mrb[46].mxu0 %v220_v41  ;;  %1110 = vmatmul.mubr.f32.gmra.mrb[46].mxu1 %v1672_v25 }
 0x151   : > { %v343_v42 = vpop.f32.mrb[0].mxu0  ;;  %v487_v43 = vpop.f32.mrb[0].mxu1 }
 0x152   : > { %759 = vst [vmem:[%s1720_s19] sm:$0xff] %v343_v42  ;;  %831 = vst [vmem:[%s1720_s19 + $0x240] sm:$0xff] %v487_v43  ;;  %v345_v0 = vpop.f32.mrb[1].mxu0  ;;  %v489_v44 = vpop.f32.mrb[1].mxu1 }
 0x153   : > { %760 = vst [vmem:[%s1720_s19 + $0x8] sm:$0xff] %v345_v0  ;;  %832 = vst [vmem:[%s1720_s19 + $0x248] sm:$0xff] %v489_v44 }
 0x155   : > { %v349_v45 = vpop.f32.mrb[2].mxu0  ;;  %v493_v46 = vpop.f32.mrb[2].mxu1 }
 0x156   : > { %762 = vst [vmem:[%s1720_s19 + $0x18] sm:$0xff] %v349_v45  ;;  %834 = vst [vmem:[%s1720_s19 + $0x258] sm:$0xff] %v493_v46  ;;  %v351_v47 = vpop.f32.mrb[3].mxu0  ;;  %v495_v48 = vpop.f32.mrb[3].mxu1 }
 0x157   : > { %763 = vst [vmem:[%s1720_s19 + $0x20] sm:$0xff] %v351_v47  ;;  %835 = vst [vmem:[%s1720_s19 + $0x260] sm:$0xff] %v495_v48 }
 0x159   : > { %v355_v49 = vpop.f32.mrb[4].mxu0  ;;  %v499_v50 = vpop.f32.mrb[4].mxu1 }
 0x15a   : > { %765 = vst [vmem:[%s1720_s19 + $0x30] sm:$0xff] %v355_v49  ;;  %837 = vst [vmem:[%s1720_s19 + $0x270] sm:$0xff] %v499_v50  ;;  %v357_v51 = vpop.f32.mrb[5].mxu0  ;;  %v501_v52 = vpop.f32.mrb[5].mxu1 }
 0x15b   : > { %766 = vst [vmem:[%s1720_s19 + $0x38] sm:$0xff] %v357_v51  ;;  %838 = vst [vmem:[%s1720_s19 + $0x278] sm:$0xff] %v501_v52 }
 0x15d   : > { %v361_v53 = vpop.f32.mrb[6].mxu0  ;;  %v505_v54 = vpop.f32.mrb[6].mxu1 }
 0x15e   : > { %768 = vst [vmem:[%s1720_s19 + $0x48] sm:$0xff] %v361_v53  ;;  %840 = vst [vmem:[%s1720_s19 + $0x288] sm:$0xff] %v505_v54  ;;  %v363_v55 = vpop.f32.mrb[7].mxu0  ;;  %v507_v56 = vpop.f32.mrb[7].mxu1 }
 0x15f   : > { %769 = vst [vmem:[%s1720_s19 + $0x50] sm:$0xff] %v363_v55  ;;  %841 = vst [vmem:[%s1720_s19 + $0x290] sm:$0xff] %v507_v56 }
 0x161   : > { %v367_v57 = vpop.f32.mrb[8].mxu0  ;;  %v511_v58 = vpop.f32.mrb[8].mxu1 }
 0x162   : > { %771 = vst [vmem:[%s1720_s19 + $0x60] sm:$0xff] %v367_v57  ;;  %843 = vst [vmem:[%s1720_s19 + $0x2a0] sm:$0xff] %v511_v58  ;;  %v369_v59 = vpop.f32.mrb[9].mxu0  ;;  %v513_v60 = vpop.f32.mrb[9].mxu1 }
 0x163   : > { %772 = vst [vmem:[%s1720_s19 + $0x68] sm:$0xff] %v369_v59  ;;  %844 = vst [vmem:[%s1720_s19 + $0x2a8] sm:$0xff] %v513_v60 }
 0x165   : > { %v373_v61 = vpop.f32.mrb[10].mxu0  ;;  %v517_v62 = vpop.f32.mrb[10].mxu1 }
 0x166   : > { %774 = vst [vmem:[%s1720_s19 + $0x78] sm:$0xff] %v373_v61  ;;  %846 = vst [vmem:[%s1720_s19 + $0x2b8] sm:$0xff] %v517_v62  ;;  %v375_v63 = vpop.f32.mrb[11].mxu0  ;;  %v519_v1 = vpop.f32.mrb[11].mxu1 }
 0x167   : > { %775 = vst [vmem:[%s1720_s19 + $0x80] sm:$0xff] %v375_v63  ;;  %847 = vst [vmem:[%s1720_s19 + $0x2c0] sm:$0xff] %v519_v1 }
 0x169   : > { %v379_v2 = vpop.f32.mrb[12].mxu0  ;;  %v523_v3 = vpop.f32.mrb[12].mxu1 }
 0x16a   : > { %777 = vst [vmem:[%s1720_s19 + $0x90] sm:$0xff] %v379_v2  ;;  %849 = vst [vmem:[%s1720_s19 + $0x2d0] sm:$0xff] %v523_v3  ;;  %v381_v4 = vpop.f32.mrb[13].mxu0  ;;  %v525_v5 = vpop.f32.mrb[13].mxu1 }
 0x16b   : > { %778 = vst [vmem:[%s1720_s19 + $0x98] sm:$0xff] %v381_v4  ;;  %850 = vst [vmem:[%s1720_s19 + $0x2d8] sm:$0xff] %v525_v5 }
 0x16d   : > { %v385_v6 = vpop.f32.mrb[14].mxu0  ;;  %v529_v7 = vpop.f32.mrb[14].mxu1 }
 0x16e   : > { %780 = vst [vmem:[%s1720_s19 + $0xa8] sm:$0xff] %v385_v6  ;;  %852 = vst [vmem:[%s1720_s19 + $0x2e8] sm:$0xff] %v529_v7  ;;  %v387_v8 = vpop.f32.mrb[15].mxu0  ;;  %v531_v9 = vpop.f32.mrb[15].mxu1 }
 0x16f   : > { %781 = vst [vmem:[%s1720_s19 + $0xb0] sm:$0xff] %v387_v8  ;;  %853 = vst [vmem:[%s1720_s19 + $0x2f0] sm:$0xff] %v531_v9 }
 0x171   : > { %v391_v10 = vpop.f32.mrb[16].mxu0  ;;  %v1066_v11 = vpop.f32.mrb[16].mxu1 }
 0x172   : > { %783 = vst [vmem:[%s1720_s19 + $0xc0] sm:$0xff] %v391_v10  ;;  %764 = vst [vmem:[%s1720_s19 + $0x28] sm:$0xff] %v1066_v11  ;;  %v393_v12 = vpop.f32.mrb[17].mxu0  ;;  %v600_v13 = vpop.f32.mrb[17].mxu1 }
 0x173   : > { %784 = vst [vmem:[%s1720_s19 + $0xc8] sm:$0xff] %v393_v12  ;;  %761 = vst [vmem:[%s1720_s19 + $0x10] sm:$0xff] %v600_v13 }
 0x175   : > { %v397_v14 = vpop.f32.mrb[18].mxu0  ;;  %v1069_v15 = vpop.f32.mrb[18].mxu1 }
 0x176   : > { %786 = vst [vmem:[%s1720_s19 + $0xd8] sm:$0xff] %v397_v14  ;;  %770 = vst [vmem:[%s1720_s19 + $0x58] sm:$0xff] %v1069_v15  ;;  %v399_v16 = vpop.f32.mrb[19].mxu0  ;;  %v610_v17 = vpop.f32.mrb[19].mxu1 }
 0x177   : > { %787 = vst [vmem:[%s1720_s19 + $0xe0] sm:$0xff] %v399_v16  ;;  %767 = vst [vmem:[%s1720_s19 + $0x40] sm:$0xff] %v610_v17 }
 0x179   : > { %v403_v18 = vpop.f32.mrb[20].mxu0  ;;  %v1072_v19 = vpop.f32.mrb[20].mxu1 }
 0x17a   : > { %789 = vst [vmem:[%s1720_s19 + $0xf0] sm:$0xff] %v403_v18  ;;  %776 = vst [vmem:[%s1720_s19 + $0x88] sm:$0xff] %v1072_v19  ;;  %v405_v20 = vpop.f32.mrb[21].mxu0  ;;  %v620_v21 = vpop.f32.mrb[21].mxu1 }
 0x17b   : > { %790 = vst [vmem:[%s1720_s19 + $0xf8] sm:$0xff] %v405_v20  ;;  %773 = vst [vmem:[%s1720_s19 + $0x70] sm:$0xff] %v620_v21 }
 0x17d   : > { %v409_v22 = vpop.f32.mrb[22].mxu0  ;;  %v1075_v23 = vpop.f32.mrb[22].mxu1 }
 0x17e   : > { %792 = vst [vmem:[%s1720_s19 + $0x108] sm:$0xff] %v409_v22  ;;  %782 = vst [vmem:[%s1720_s19 + $0xb8] sm:$0xff] %v1075_v23  ;;  %v411_v24 = vpop.f32.mrb[23].mxu0  ;;  %v630_v25 = vpop.f32.mrb[23].mxu1 }
 0x17f   : > { %793 = vst [vmem:[%s1720_s19 + $0x110] sm:$0xff] %v411_v24  ;;  %779 = vst [vmem:[%s1720_s19 + $0xa0] sm:$0xff] %v630_v25 }
 0x181   : > { %v415_v26 = vpop.f32.mrb[24].mxu0  ;;  %v1078_v27 = vpop.f32.mrb[24].mxu1 }
 0x182   : > { %795 = vst [vmem:[%s1720_s19 + $0x120] sm:$0xff] %v415_v26  ;;  %788 = vst [vmem:[%s1720_s19 + $0xe8] sm:$0xff] %v1078_v27  ;;  %v417_v28 = vpop.f32.mrb[25].mxu0  ;;  %v640_v29 = vpop.f32.mrb[25].mxu1 }
 0x183   : > { %796 = vst [vmem:[%s1720_s19 + $0x128] sm:$0xff] %v417_v28  ;;  %785 = vst [vmem:[%s1720_s19 + $0xd0] sm:$0xff] %v640_v29 }
 0x185   : > { %v421_v30 = vpop.f32.mrb[26].mxu0  ;;  %v1081_v31 = vpop.f32.mrb[26].mxu1 }
 0x186   : > { %798 = vst [vmem:[%s1720_s19 + $0x138] sm:$0xff] %v421_v30  ;;  %794 = vst [vmem:[%s1720_s19 + $0x118] sm:$0xff] %v1081_v31  ;;  %v423_v32 = vpop.f32.mrb[27].mxu0  ;;  %v650_v33 = vpop.f32.mrb[27].mxu1 }
 0x187   : > { %799 = vst [vmem:[%s1720_s19 + $0x140] sm:$0xff] %v423_v32  ;;  %791 = vst [vmem:[%s1720_s19 + $0x100] sm:$0xff] %v650_v33 }
 0x189   : > { %v427_v34 = vpop.f32.mrb[28].mxu0  ;;  %v1084_v35 = vpop.f32.mrb[28].mxu1 }
 0x18a   : > { %801 = vst [vmem:[%s1720_s19 + $0x150] sm:$0xff] %v427_v34  ;;  %800 = vst [vmem:[%s1720_s19 + $0x148] sm:$0xff] %v1084_v35  ;;  %v429_v36 = vpop.f32.mrb[29].mxu0  ;;  %v660_v37 = vpop.f32.mrb[29].mxu1 }
 0x18b   : > { %802 = vst [vmem:[%s1720_s19 + $0x158] sm:$0xff] %v429_v36  ;;  %797 = vst [vmem:[%s1720_s19 + $0x130] sm:$0xff] %v660_v37 }
 0x18d   : > { %v433_v38 = vpop.f32.mrb[30].mxu0  ;;  %v1087_v39 = vpop.f32.mrb[30].mxu1 }
 0x18e   : > { %804 = vst [vmem:[%s1720_s19 + $0x168] sm:$0xff] %v433_v38  ;;  %806 = vst [vmem:[%s1720_s19 + $0x178] sm:$0xff] %v1087_v39  ;;  %v435_v40 = vpop.f32.mrb[31].mxu0  ;;  %v670_v41 = vpop.f32.mrb[31].mxu1 }
 0x18f   : > { %805 = vst [vmem:[%s1720_s19 + $0x170] sm:$0xff] %v435_v40  ;;  %803 = vst [vmem:[%s1720_s19 + $0x160] sm:$0xff] %v670_v41 }
 0x191   : > { %v439_v42 = vpop.f32.mrb[32].mxu0  ;;  %v1090_v43 = vpop.f32.mrb[32].mxu1 }
 0x192   : > { %807 = vst [vmem:[%s1720_s19 + $0x180] sm:$0xff] %v439_v42  ;;  %812 = vst [vmem:[%s1720_s19 + $0x1a8] sm:$0xff] %v1090_v43  ;;  %v441_v0 = vpop.f32.mrb[33].mxu0  ;;  %v680_v44 = vpop.f32.mrb[33].mxu1 }
 0x193   : > { %808 = vst [vmem:[%s1720_s19 + $0x188] sm:$0xff] %v441_v0  ;;  %809 = vst [vmem:[%s1720_s19 + $0x190] sm:$0xff] %v680_v44 }
 0x195   : > { %v445_v45 = vpop.f32.mrb[34].mxu0  ;;  %v1093_v46 = vpop.f32.mrb[34].mxu1 }
 0x196   : > { %810 = vst [vmem:[%s1720_s19 + $0x198] sm:$0xff] %v445_v45  ;;  %818 = vst [vmem:[%s1720_s19 + $0x1d8] sm:$0xff] %v1093_v46  ;;  %v447_v47 = vpop.f32.mrb[35].mxu0  ;;  %v690_v48 = vpop.f32.mrb[35].mxu1 }
 0x197   : > { %811 = vst [vmem:[%s1720_s19 + $0x1a0] sm:$0xff] %v447_v47  ;;  %815 = vst [vmem:[%s1720_s19 + $0x1c0] sm:$0xff] %v690_v48 }
 0x199   : > { %v451_v49 = vpop.f32.mrb[36].mxu0  ;;  %v1096_v50 = vpop.f32.mrb[36].mxu1 }
 0x19a   : > { %813 = vst [vmem:[%s1720_s19 + $0x1b0] sm:$0xff] %v451_v49  ;;  %824 = vst [vmem:[%s1720_s19 + $0x208] sm:$0xff] %v1096_v50  ;;  %v453_v51 = vpop.f32.mrb[37].mxu0  ;;  %v700_v52 = vpop.f32.mrb[37].mxu1 }
 0x19b   : > { %814 = vst [vmem:[%s1720_s19 + $0x1b8] sm:$0xff] %v453_v51  ;;  %821 = vst [vmem:[%s1720_s19 + $0x1f0] sm:$0xff] %v700_v52 }
 0x19d   : > { %v457_v53 = vpop.f32.mrb[38].mxu0  ;;  %v1099_v54 = vpop.f32.mrb[38].mxu1 }
 0x19e   : > { %816 = vst [vmem:[%s1720_s19 + $0x1c8] sm:$0xff] %v457_v53  ;;  %830 = vst [vmem:[%s1720_s19 + $0x238] sm:$0xff] %v1099_v54  ;;  %v459_v55 = vpop.f32.mrb[39].mxu0  ;;  %v710_v56 = vpop.f32.mrb[39].mxu1 }
 0x19f   : > { %817 = vst [vmem:[%s1720_s19 + $0x1d0] sm:$0xff] %v459_v55  ;;  %827 = vst [vmem:[%s1720_s19 + $0x220] sm:$0xff] %v710_v56 }
 0x1a1   : > { %v463_v57 = vpop.f32.mrb[40].mxu0  ;;  %v1102_v58 = vpop.f32.mrb[40].mxu1 }
 0x1a2   : > { %819 = vst [vmem:[%s1720_s19 + $0x1e0] sm:$0xff] %v463_v57  ;;  %836 = vst [vmem:[%s1720_s19 + $0x268] sm:$0xff] %v1102_v58  ;;  %v465_v59 = vpop.f32.mrb[41].mxu0  ;;  %v720_v60 = vpop.f32.mrb[41].mxu1 }
 0x1a3   : > { %820 = vst [vmem:[%s1720_s19 + $0x1e8] sm:$0xff] %v465_v59  ;;  %833 = vst [vmem:[%s1720_s19 + $0x250] sm:$0xff] %v720_v60 }
 0x1a5   : > { %v469_v61 = vpop.f32.mrb[42].mxu0  ;;  %v1105_v62 = vpop.f32.mrb[42].mxu1 }
 0x1a6   : > { %822 = vst [vmem:[%s1720_s19 + $0x1f8] sm:$0xff] %v469_v61  ;;  %842 = vst [vmem:[%s1720_s19 + $0x298] sm:$0xff] %v1105_v62  ;;  %v471_v63 = vpop.f32.mrb[43].mxu0  ;;  %v730_v1 = vpop.f32.mrb[43].mxu1 }
 0x1a7   : > { %823 = vst [vmem:[%s1720_s19 + $0x200] sm:$0xff] %v471_v63  ;;  %839 = vst [vmem:[%s1720_s19 + $0x280] sm:$0xff] %v730_v1 }
 0x1a9   : > { %v475_v2 = vpop.f32.mrb[44].mxu0  ;;  %v1108_v3 = vpop.f32.mrb[44].mxu1 }
 0x1aa   : > { %825 = vst [vmem:[%s1720_s19 + $0x210] sm:$0xff] %v475_v2  ;;  %848 = vst [vmem:[%s1720_s19 + $0x2c8] sm:$0xff] %v1108_v3  ;;  %v477_v4 = vpop.f32.mrb[45].mxu0  ;;  %v740_v5 = vpop.f32.mrb[45].mxu1 }
 0x1ab   : > { %826 = vst [vmem:[%s1720_s19 + $0x218] sm:$0xff] %v477_v4  ;;  %845 = vst [vmem:[%s1720_s19 + $0x2b0] sm:$0xff] %v740_v5 }
 0x1ad   : > { %v481_v6 = vpop.f32.mrb[46].mxu0  ;;  %v1111_v7 = vpop.f32.mrb[46].mxu1 }
 0x1ae   : > { %828 = vst [vmem:[%s1720_s19 + $0x228] sm:$0xff] %v481_v6  ;;  %854 = vst [vmem:[%s1720_s19 + $0x2f8] sm:$0xff] %v1111_v7  ;;  %v483_v8 = vpop.f32.mrb[47].mxu0  ;;  %v750_v9 = vpop.f32.mrb[47].mxu1 }
 0x1af   : > { %829 = vst [vmem:[%s1720_s19 + $0x230] sm:$0xff] %v483_v8  ;;  %851 = vst [vmem:[%s1720_s19 + $0x2e0] sm:$0xff] %v750_v9 }
 0x1b0   : > { %1345 = shalt.err (!%p1342_p5)
}
 0x1b1   : > { %s1346_s3 = scalar_lea.hbm %s1819_s7, 12288  ;;  %s1350_s16 = scalar_lea.hbm %s1876_s2, 24576 }
 0x1b2   : > { %p1347_p9 = scmp.ne.s32.totalorder %s1819_s7, %s1346_s3  ;;  %p1351_p3 = scmp.lt.u32.totalorder %s1819_s7, %s1876_s2 }
 0x1b3   : > { %p1352_p7 = scmp.lt.u32.totalorder %s1350_s16, %s1346_s3  ;;  %p1354_p4 = scmp.lt.u32.totalorder %s1346_s3, %s1819_s7 }
 0x1b4   : > { %p1348_p1 = pnand %p1347_p9, %p1541_p10 }
 0x1b5   : > { %p1353_p13 = por %p1352_p7, %p1351_p3 }
 0x1b6   : > { %p1349_p2 = pneg %p1348_p1 }
 0x1b7   : > { %p1355_p6 = por %p1354_p4, %p1353_p13 }
 0x1b9   : > { %p1356_p8 = pnand %p1355_p6, %p1349_p2 }
 0x1bb   : > { %1359 = shalt.err (!%p1356_p8)
}
 0x1bc   : > { %s1428_s17 = smov 384   ;;  %s1429_s19 = smov 24  }
 0x1bd   : > { %1200 = dma.vmem_to_hbm [thread:$0]  (%p1541_p10), %s1821_s4, 12288, %s1819_s7, %s856_s12, %s1428_s17, %s1428_s17, %s1429_s19  }
 0x1be PF: > { %s887_s21 = sand.u32 1, %s1398_s9   ;;  %p1894_p12 = scmp.ne.s32.totalorder %s1884_s20, 0 }
 0x1bf   : > { %p1895_p11 = scmp.ge.s32.totalorder %s1418_s14, 2  ;;  %s888_s5 = scalar_lea.sflag [#allocation4], %s887_s21 }
 0x1c1   : > { %p1211_p0 = pnand %p1895_p11, %p1894_p12 }
 0x1c3   : > { %1393 = dma.done.wait (!%p1211_p0), %s888_s5, 12288  }
 0x1c4   : > { %1395 = vsyncadd (!%p1211_p0), %s888_s5, 4294955008  ;;  %s19_s14 = sadd.s32 1, %s1418_s14   ;;  %s1896_s9 = smov %s1402_s10 }
 0x1c5   : > { %p16_p5 = scmp.ge.s32.totalorder %s19_s14, 4   ;;  %s1897_s10 = smov %s1406_s11 }
 0x1c6   : > { %s1898_s11 = smov %s1550_s28  ;;  %s1899_s12 = smov %s1414_s13 }
 0x1c7   : > { %s1900_s13 = smov %s1902_s25  ;;  %18 = sbr.rel (!%p16_p5) target bundleno = 7 (0x7), region = 77 }
 0x1ce   :  { %893 = vsyncpa [#allocation3], 1 }
 0x1cf   :  { %895 = vsyncpa [#allocation3 + $0x1], 1 }
 0x1d0   :  { %896 = vsyncpa [#allocation6], 1 }
 0x1d1   :  { %897 = vsyncpa [#allocation4], 1 }
 0x1d2   :  { %899 = vsyncpa [#allocation4 + $0x1], 1 }

</bundles_post_ra>
